<compile_context>
chip_gen: v5e
topology: v5e:2x2
jax: 0.10.0
libtpu: 0.0.40
codegen_flags: <defaults>
</compile_context>

<pallas_src>
import functools

import jax
import jax.numpy as jnp
from jax.experimental import pallas as pl
from jax.experimental.pallas import tpu as pltpu

LANE = 128
# ~2 MiB per block: safe under v5e's 16 MiB default scoped VMEM
# (in + out, double-buffered = 4 blocks = 8 MiB) and within a few % of the
# HBM roofline on v5e / v6e / v7x (measured: >=1 MiB blocks ~85-86% of roofline).
_TARGET_BLOCK_BYTES = 2 * 1024 * 1024


def _sublane_pack(dtype) -> int:
    """Sublane packing factor per vreg: 8 for 4-byte, 16 for 2-byte, 32 for 1-byte dtypes."""
    itemsize = jnp.dtype(dtype).itemsize
    return max(8, 32 // max(itemsize, 1))


def _clamp_kernel(x_ref, o_ref, *, min_val: float, max_val: float):
    x = x_ref[...]
    lo = jnp.asarray(min_val, x.dtype)
    hi = jnp.asarray(max_val, x.dtype)
    o_ref[...] = jnp.clip(x, lo, hi)


def output_range_postprocess(img, min_val: float = 0.0, max_val: float = 1.0):
    """Clamp `img` (any shape / dtype) to [min_val, max_val] via a Pallas TPU kernel."""
    orig_shape = img.shape
    dtype = img.dtype
    n = img.size
    if n == 0:
        return img

    itemsize = jnp.dtype(dtype).itemsize
    sub = _sublane_pack(dtype)

    flat = jnp.ravel(img)

    # Lane-dense 2D slab.  No padding whenever n is a multiple of 128 (true for the
    # common NCHW image shapes); otherwise pad at most 127 elements.
    # TODO(synk): the rare n % 128 != 0 path still materialises a padded copy; a tiny
    # second call on the <128-element tail would avoid the extra HBM pass.
    rem = n % LANE
    if rem:
        flat = jnp.concatenate([flat, jnp.zeros((LANE - rem,), dtype=dtype)])
    rows = flat.size // LANE
    x2d = flat.reshape(rows, LANE)

    # Block sizing: ~2 MiB blocks regardless of dtype; rows dim is a multiple of the
    # dtype's sublane packing.  Never shrink the tile — a ragged final block is fine.
    row_tile = _TARGET_BLOCK_BYTES // (LANE * itemsize)
    row_tile = max(sub, (row_tile // sub) * sub)
    if row_tile >= rows:
        row_tile = rows  # single block == full array (always a legal block shape)
        grid = (1,)
    else:
        grid = (pl.cdiv(rows, row_tile),)  # Pallas masks the partial final block

    kernel = functools.partial(
        _clamp_kernel, min_val=float(min_val), max_val=float(max_val)
    )

    cost = pl.CostEstimate(
        flops=n, transcendentals=0, bytes_accessed=2 * n * itemsize
    )

    out2d = pl.pallas_call(
        kernel,
        out_shape=jax.ShapeDtypeStruct((rows, LANE), dtype),
        grid_spec=pltpu.PrefetchScalarGridSpec(
            num_scalar_prefetch=0,
            grid=grid,
            in_specs=[pl.BlockSpec((row_tile, LANE), lambda i: (i, 0))],
            out_specs=pl.BlockSpec((row_tile, LANE), lambda i: (i, 0)),
        ),
        compiler_params=pltpu.CompilerParams(
            dimension_semantics=("parallel",),
        ),
        cost_estimate=cost,
    )(x2d)

    out_flat = out2d.reshape(-1)
    if rem:
        out_flat = out_flat[:n]
    return out_flat.reshape(orig_shape)


class OutputRangePostProcessor:
    """JAX/Pallas equivalent of kornia's OutputRangePostProcessor."""

    def __init__(self, min_val: float = 0.0, max_val: float = 1.0) -> None:
        self.min_val = min_val
        self.max_val = max_val

    def __call__(self, imgs):
        if isinstance(imgs, (list, tuple)):
            return [output_range_postprocess(im, self.min_val, self.max_val) for im in imgs]
        return output_range_postprocess(imgs, self.min_val, self.max_val)


if __name__ == "__main__":
    key = jax.random.PRNGKey(0)
    # Small NCHW input; values outside [0, 1] to exercise the clamp.
    x = jax.random.normal(key, (2, 4, 16, 16), dtype=jnp.float32) * 2.0

    proc = OutputRangePostProcessor(min_val=0.0, max_val=1.0)
    y = proc(x)
    y = jax.block_until_ready(y)

    # Correctness check against plain JAX reference.
    ref = jnp.clip(x, 0.0, 1.0)
    assert y.shape == x.shape and y.dtype == x.dtype
    assert jnp.allclose(y, ref), "mismatch vs reference clamp"

    # List path (matches the torch module's list branch).
    ys = proc([x, x * 0.5])
    ys = jax.block_until_ready(ys)
    assert jnp.allclose(ys[0], ref)
    assert jnp.allclose(ys[1], jnp.clip(x * 0.5, 0.0, 1.0))

    # Sub-32-bit dtype path (dtype-aware sublane packing).
    xb = (jax.random.normal(key, (1, 3, 16, 16), dtype=jnp.float32) * 2.0).astype(jnp.bfloat16)
    yb = jax.block_until_ready(output_range_postprocess(xb, 0.0, 1.0))
    assert yb.dtype == jnp.bfloat16 and yb.shape == xb.shape
    assert jnp.allclose(yb.astype(jnp.float32), jnp.clip(xb.astype(jnp.float32), 0.0, 1.0))

    print("KERNEL_OK")
</pallas_src>

<mosaic_0001>
module attributes {stable_mosaic.version = 11 : i64} {
  func.func @_clamp_kernel(%arg0: i32, %arg1: memref<16x128xf32, #tpu.memory_space<vmem>>, %arg2: memref<16x128xf32, #tpu.memory_space<vmem>>) attributes {dimension_semantics = [#tpu.dimension_semantics<parallel>], iteration_bounds = array<i64: 1>, scalar_prefetch = 0 : i64, scratch_operands = 0 : i64, tpu.core_type = #tpu.core_type<tc>, window_params = [{transform_indices = @transform_0, window_bounds = array<i64: 16, 128>}, {transform_indices = @transform_1, window_bounds = array<i64: 16, 128>}]} {
    %c0 = arith.constant 0 : index
    %c0_0 = arith.constant 0 : index
    %0 = vector.load %arg1[%c0, %c0_0] : memref<16x128xf32, #tpu.memory_space<vmem>>, vector<16x128xf32>
    %cst = arith.constant 0.000000e+00 : f32
    %cst_1 = arith.constant 1.000000e+00 : f32
    %1 = vector.broadcast %cst : f32 to vector<16x128xf32>
    %2 = arith.maximumf %1, %0 : vector<16x128xf32>
    %3 = vector.broadcast %cst_1 : f32 to vector<16x128xf32>
    %4 = arith.minimumf %3, %2 : vector<16x128xf32>
    %c0_2 = arith.constant 0 : index
    %c0_3 = arith.constant 0 : index
    %5 = vector.load %arg2[%c0_2, %c0_3] : memref<16x128xf32, #tpu.memory_space<vmem>>, vector<16x128xf32>
    tpu.vector_store %arg2[%c0_2, %c0_3], %4 {strides = array<i32>} : memref<16x128xf32, #tpu.memory_space<vmem>>, vector<16x128xf32>,
    return
  }
  func.func @transform_0(%arg0: i32) -> (i32, i32) {
    %c0_i32 = arith.constant 0 : i32
    %c0_i32_0 = arith.constant 0 : i32
    return %arg0, %c0_i32 : i32, i32
  }
  func.func @transform_1(%arg0: i32) -> (i32, i32) {
    %c0_i32 = arith.constant 0 : i32
    %c0_i32_0 = arith.constant 0 : i32
    return %arg0, %c0_i32 : i32, i32
  }
}

</mosaic_0001>

<bundles_post_ra>
// kernel: tpu_custom_call.1
= control target key start
LH: loop header
LB: loop body
LE: loop exit
PB: predicated region body
PF: predicated region fallthrough
CT: control target
= control target key end

     0   :  { %6 = vsyncpa [#allocation3], 0  ;;  %s128_s0 = inlined_call_operand.hbm [shape: f32[16,128], index: 0, kind: input, shape index: {}]   ;;  %s129_s1 = inlined_call_operand.hbm [shape: f32[16,128], index: 1, kind: output, shape index: {}]  }
   0x1   :  { %7 = vsyncpa [#allocation4], 0  ;;  %s12_s8 = sshll.u32 %s128_s0, 4  ;;  %s108_s9 = smov [#allocation2]   ;;  %s13_s8 = int_to_ptr.hbm [resolvable:$true] %s12_s8 }
   0x2   :  { %s14_s10 = sshll.u32 %s108_s9, 4  ;;  %s109_s11 = smov 128   ;;  %s15_s10 = int_to_ptr.vmem [resolvable:$true] %s14_s10 }
   0x3   :  { %s110_s12 = smov 8  }
   0x4   :  { %20 = dma.hbm_to_vmem [thread:$0]  %s13_s8, 256, %s15_s10, [#allocation3], %s109_s11, %s109_s11, %s110_s12  }
   0x5   :  { %104 = dma.done.wait [#allocation3], 256  }
   0x6   :  { %105 = vsyncadd [#allocation3], 4294967040  ;;  %v25_v0 = vld [vmem:[#allocation2] sm:$0xff]  ;;  %v26_v1 = vld [vmem:[#allocation2 + $0x8] sm:$0xff]  ;;  %s111_s13 = smov [#allocation5]   ;;  %s39_s17 = sshll.u32 %s129_s1, 4  ;;  %s40_s17 = int_to_ptr.hbm [resolvable:$true] %s39_s17 }
   0x7   :  { %v27_v2 = vmax.f32 %v25_v0, 0.0  ;;  %v28_v3 = vmax.f32 %v26_v1, 0.0  ;;  %s37_s14 = sshll.u32 %s111_s13, 4  ;;  %s38_s14 = int_to_ptr.vmem [resolvable:$true] %s37_s14 }
   0x9   :  { %v29_v4 = vmin.f32 %v27_v2, 1.0  ;;  %v30_v5 = vmin.f32 %v28_v3, 1.0 }
   0xb   :  { %31 = vst [vmem:[#allocation5] sm:$0xff] %v29_v4 }
   0xc   :  { %32 = vst [vmem:[#allocation5 + $0x8] sm:$0xff] %v30_v5 }
   0xd   :  { %45 = dma.vmem_to_hbm [thread:$0]  %s38_s14, 256, %s40_s17, [#allocation4], %s109_s11, %s109_s11, %s110_s12  }
   0xe   :  { %106 = dma.done.wait [#allocation4], 256  }
   0xf   :  { %107 = vsyncadd [#allocation4], 4294967040 }
  0x10   :  { %50 = vsyncpa [#allocation3], 1 }
  0x11   :  { %51 = vsyncpa [#allocation4], 1 }

</bundles_post_ra>
